<compile_context>
chip_gen: v7x
topology: tpu7x:2x2x1
jax: 0.10.0
libtpu: 0.0.40
codegen_flags: <defaults>
</compile_context>

<pallas_src>
import functools
from typing import NamedTuple

import jax
import jax.numpy as jnp
from jax import lax
from jax.experimental import pallas as pl
from jax.experimental.pallas import tpu as pltpu


_VMEM_TILE_BUDGET = 32 * 1024 * 1024   # double-buffered working-set budget
_VMEM_LIMIT_BYTES = 48 * 1024 * 1024   # scoped-VMEM limit handed to Mosaic


def _round_up(x, m):
    return (x + m - 1) // m * m


def _sublane(dtype):
    # 8 sublanes for 32-bit, 16 for bf16, 32 for int8/fp8.
    return max(8, 32 // jnp.dtype(dtype).itemsize)


class FCParams(NamedTuple):
    """One-time-prepared FC parameters (cache this outside the hot path)."""
    w_t: jax.Array      # (Kp, Np): weight.T zero-padded to 128 multiples
    b: jax.Array        # (1, Np): bias zero-padded
    in_size: int
    out_size: int


def prepare_fc_params(weight, bias, *, weight_dtype=None):
    """Transpose to (in, out) layout and pad to lane-aligned (Kp, Np) once.

    weight: (out_size, in_size)  -- PyTorch nn.Linear layout
    bias:   (out_size,)
    weight_dtype: optional storage/compute dtype for the weight (e.g. bf16)
                  -- opt-in, changes numerics slightly.
    """
    out_size, in_size = weight.shape
    Kp = _round_up(in_size, 128)
    Np = _round_up(out_size, 128)
    w_t = weight.T
    if weight_dtype is not None:
        w_t = w_t.astype(weight_dtype)
    if (in_size, out_size) != (Kp, Np):
        w_t = jnp.pad(w_t, ((0, Kp - in_size), (0, Np - out_size)))
    b2 = bias.reshape(1, out_size)
    if out_size != Np:
        b2 = jnp.pad(b2, ((0, 0), (0, Np - out_size)))
    return FCParams(w_t=w_t, b=b2, in_size=in_size, out_size=out_size)


# ---------------------------------------------------------------------------
# Dropout mask: counter-based hash of global (row, col, seed) coordinates.
# Reproducible across tile sizes / grids; only standard integer ops are used.
# ---------------------------------------------------------------------------
def _dropout_keep_mask(shape, row0, col0, seed, threshold31):
    rows = row0 + lax.broadcasted_iota(jnp.int32, shape, 0)
    cols = col0 + lax.broadcasted_iota(jnp.int32, shape, 1)
    h = (rows.astype(jnp.uint32) * jnp.uint32(0x9E3779B1)
         + cols.astype(jnp.uint32) * jnp.uint32(0x85EBCA77)
         + seed.astype(jnp.uint32) * jnp.uint32(0xC2B2AE3D))
    # murmur3-style finalizer
    h = h ^ (h >> 16)
    h = h * jnp.uint32(0x7FEB352D)
    h = h ^ (h >> 15)
    h = h * jnp.uint32(0x846CA68B)
    h = h ^ (h >> 16)
    bits31 = (h >> 1).astype(jnp.int32)           # uniform in [0, 2^31)
    return bits31 >= jnp.int32(threshold31)       # keep with prob (1 - r)


def _finish(y, b_ref, o_ref, use_relu, do_dropout, dropout_r,
            row0, col0, seed, threshold31):
    y = y + b_ref[...].astype(jnp.float32)
    if use_relu:
        y = jnp.maximum(y, 0.0)
    if do_dropout:
        keep = _dropout_keep_mask(y.shape, row0, col0, seed, threshold31)
        y = jnp.where(keep, y * (1.0 / (1.0 - dropout_r)), 0.0)
    o_ref[...] = y.astype(o_ref.dtype)


# ---------------------------------------------------------------------------
# Kernels
# ---------------------------------------------------------------------------
def _fc_kernel_single(seed_ref, x_ref, w_ref, b_ref, o_ref, *,
                      use_relu, dropout_r, training, threshold31, tm, tn):
    # Single K step: matmul result goes straight to the output block.
    do_dropout = (dropout_r > 0.0) and training
    row0 = col0 = seed = None
    if do_dropout:
        row0 = pl.program_id(0) * tm
        col0 = pl.program_id(1) * tn
        seed = seed_ref[0]

    xv = x_ref[...]
    wv = w_ref[...]
    if xv.dtype != wv.dtype:
        xv = xv.astype(wv.dtype)
    y = jnp.dot(xv, wv, preferred_element_type=jnp.float32)
    _finish(y, b_ref, o_ref, use_relu, do_dropout, dropout_r,
            row0, col0, seed, threshold31)


def _fc_kernel_multi(seed_ref, x_ref, w_ref, b_ref, o_ref, acc_ref, *,
                     use_relu, dropout_r, training, threshold31, tm, tn, nk):
    # K-grid accumulator variant (large in_size).
    # NOTE: program_id / scalar reads are hoisted out of the pl.when bodies.
    k = pl.program_id(2)
    do_dropout = (dropout_r > 0.0) and training
    row0 = col0 = seed = None
    if do_dropout:
        row0 = pl.program_id(0) * tm
        col0 = pl.program_id(1) * tn
        seed = seed_ref[0]

    @pl.when(k == 0)
    def _():
        acc_ref[...] = jnp.zeros_like(acc_ref)

    xv = x_ref[...]
    wv = w_ref[...]
    if xv.dtype != wv.dtype:
        xv = xv.astype(wv.dtype)
    acc_ref[...] += jnp.dot(xv, wv, preferred_element_type=jnp.float32)

    @pl.when(k == nk - 1)
    def _():
        _finish(acc_ref[...], b_ref, o_ref, use_relu, do_dropout, dropout_r,
                row0, col0, seed, threshold31)


# ---------------------------------------------------------------------------
# Tile selection
# ---------------------------------------------------------------------------
def _tk_candidates(Kp):
    q = Kp // 128
    return sorted((128 * d for d in range(1, q + 1) if q % d == 0),
                  reverse=True)


def _select_tiles(M, Np, Kp, x_item, w_item, o_item, sub, tm, tn, tk):
    """Pick (tm, tn, tk) against the VMEM budget; prefer a single K step."""
    if tn is None:
        tn = min(1024, Np)
    else:
        tn = min(_round_up(tn, 128), Np)
    if tm is None:
        tm = min(512, _round_up(M, sub))
    else:
        tm = _round_up(tm, sub)

    cands = _tk_candidates(Kp)
    if tk is None:
        tk = Kp
    else:
        tk = _round_up(tk, 128)
        smaller = [c for c in cands if c <= tk]
        tk = smaller[0] if smaller else cands[-1]

    def nbytes(tm_, tn_, tk_):
        b = 2 * (tm_ * tk_ * x_item + tk_ * tn_ * w_item
                 + tm_ * tn_ * o_item + tn_ * o_item)
        if tk_ != Kp:
            b += tm_ * tn_ * 4   # f32 accumulator scratch
        return b

    while nbytes(tm, tn, tk) > _VMEM_TILE_BUDGET:
        can_shrink_k = any(c < tk for c in cands)
        if tk > 2048 and can_shrink_k:
            tk = max(c for c in cands if c < tk)
        elif tn > 256:
            tn = max(128, (tn // 2) // 128 * 128)
        elif tm > 128:
            tm = max(sub, _round_up(tm // 2, sub))
        elif can_shrink_k:
            tk = max(c for c in cands if c < tk)
        else:
            break
    return tm, tn, tk


# ---------------------------------------------------------------------------
# Forward
# ---------------------------------------------------------------------------
def fc_forward(x, params: FCParams, *, use_relu=True, dropout_r=0.0,
               training=False, seed=0, tm=None, tn=None, tk=None):
    """Pallas implementation of FC.forward: Linear -> [ReLU] -> [Dropout]."""
    in_size, out_size = params.in_size, params.out_size
    if x.shape[-1] != in_size:
        raise ValueError(f"x last dim {x.shape[-1]} != in_size {in_size}")
    if dropout_r < 0.0 or dropout_r > 1.0:
        raise ValueError("dropout_r must be in [0, 1]")
    lead = x.shape[:-1]
    if training and dropout_r >= 1.0:
        # nn.Dropout(p=1) zeroes everything; avoid an infinite keep-scale.
        return jnp.zeros((*lead, out_size), x.dtype)

    w_t, b2 = params.w_t, params.b
    Kp, Np = w_t.shape
    x2 = x.reshape(-1, in_size)
    M = x2.shape[0]

    x_item = jnp.dtype(x.dtype).itemsize
    w_item = jnp.dtype(w_t.dtype).itemsize
    o_item = x_item
    sub = _sublane(x.dtype)

    auto_tiles = (tm is None and tn is None and tk is None)
    tm, tn, tk = _select_tiles(M, Np, Kp, x_item, w_item, o_item, sub,
                               tm, tn, tk)

    # v7x has two TensorCores: make sure the parallel (M, N) grid has >= 2
    # blocks when the problem can be split (negligible cost on v5e/v6e).
    if auto_tiles:
        if (_round_up(M, tm) // tm) * pl.cdiv(Np, tn) == 1:
            if M > sub:
                tm = _round_up(pl.cdiv(M, 2), sub)
            elif Np >= 2 * 128:
                tn = _round_up(pl.cdiv(Np, 2), 128)

    Mp = _round_up(M, tm)
    # Zero-pad only x, only when needed (K padding must be real zeros since
    # it feeds the reduction); the weight/bias were padded once in prepare.
    if Mp > M or Kp > in_size:
        x2 = jnp.pad(x2, ((0, Mp - M), (0, Kp - in_size)))

    grid_m = Mp // tm
    grid_n = pl.cdiv(Np, tn)
    grid_k = Kp // tk
    single_k = (tk == Kp)

    seed_arr = jnp.array([seed], dtype=jnp.int32)
    threshold31 = min(int(round(float(dropout_r) * (1 << 31))), (1 << 31) - 1)

    cost = pl.CostEstimate(
        flops=2 * Mp * Kp * (grid_n * tn),
        transcendentals=0,
        bytes_accessed=(grid_n * Mp * Kp * x_item      # x re-streamed per N tile
                        + grid_m * Kp * Np * w_item    # W re-streamed per M tile
                        + Mp * Np * o_item))

    common = dict(use_relu=bool(use_relu), dropout_r=float(dropout_r),
                  training=bool(training), threshold31=threshold31,
                  tm=tm, tn=tn)

    if single_k:
        kernel = functools.partial(_fc_kernel_single, **common)
        grid = (grid_m, grid_n)
        in_specs = [
            pl.BlockSpec((tm, Kp), lambda i, j, s: (i, 0)),
            pl.BlockSpec((Kp, tn), lambda i, j, s: (0, j)),
            pl.BlockSpec((1, tn), lambda i, j, s: (0, j)),
        ]
        out_specs = pl.BlockSpec((tm, tn), lambda i, j, s: (i, j))
        scratch_shapes = []
        dim_sem = ("parallel", "parallel")
    else:
        kernel = functools.partial(_fc_kernel_multi, nk=grid_k, **common)
        grid = (grid_m, grid_n, grid_k)
        in_specs = [
            pl.BlockSpec((tm, tk), lambda i, j, k, s: (i, k)),
            pl.BlockSpec((tk, tn), lambda i, j, k, s: (k, j)),
            pl.BlockSpec((1, tn), lambda i, j, k, s: (0, j)),
        ]
        out_specs = pl.BlockSpec((tm, tn), lambda i, j, k, s: (i, j))
        scratch_shapes = [pltpu.VMEM((tm, tn), jnp.float32)]
        dim_sem = ("parallel", "parallel", "arbitrary")

    out = pl.pallas_call(
        kernel,
        out_shape=jax.ShapeDtypeStruct((Mp, Np), x.dtype),
        grid_spec=pltpu.PrefetchScalarGridSpec(
            num_scalar_prefetch=1,
            grid=grid,
            in_specs=in_specs,
            out_specs=out_specs,
            scratch_shapes=scratch_shapes),
        compiler_params=pltpu.CompilerParams(
            dimension_semantics=dim_sem,
            vmem_limit_bytes=_VMEM_LIMIT_BYTES),
        cost_estimate=cost,
    )(seed_arr, x2, w_t, b2)

    out = out[:M, :out_size]
    return out.reshape(*lead, out_size)


def init_fc_params(key, in_size, out_size, dtype=jnp.float32):
    """Deterministic init mirroring nn.Linear's kaiming-uniform default."""
    kw, kb = jax.random.split(key)
    bound = 1.0 / jnp.sqrt(in_size)
    weight = jax.random.uniform(kw, (out_size, in_size), dtype,
                                minval=-bound, maxval=bound)
    bias = jax.random.uniform(kb, (out_size,), dtype,
                              minval=-bound, maxval=bound)
    return weight, bias


if __name__ == "__main__":
    key = jax.random.PRNGKey(0)
    kx, kp, kx2, kp2 = jax.random.split(key, 4)

    # ---- Test 1: eval-mode FC (Linear + ReLU), single-K fast path ----
    in_size, out_size = 32, 64
    x = jax.random.normal(kx, (2, 8, in_size), dtype=jnp.float32)
    weight, bias = init_fc_params(kp, in_size, out_size)
    params = prepare_fc_params(weight, bias)      # one-time prep (cacheable)

    y = fc_forward(x, params, use_relu=True, dropout_r=0.0, training=False)
    y = jax.block_until_ready(y)
    ref = jnp.maximum(x @ weight.T + bias, 0.0)
    assert y.shape == (2, 8, out_size)
    assert jnp.allclose(y, ref, atol=1e-4, rtol=1e-4)

    # ---- Test 2: training-mode dropout path ----
    y_drop = fc_forward(x, params, use_relu=True, dropout_r=0.5,
                        training=True, seed=123)
    y_drop = jax.block_until_ready(y_drop)
    kept = y_drop != 0.0
    # Kept entries are exactly the eval activations scaled by 1/(1-p).
    assert jnp.allclose(jnp.where(kept, y_drop, 0.0),
                        jnp.where(kept, 2.0 * ref, 0.0), atol=1e-4, rtol=1e-4)
    pos = ref > 0.0
    keep_frac = float(jnp.sum(jnp.logical_and(pos, kept)) /
                      jnp.maximum(jnp.sum(pos), 1))
    assert 0.0 < keep_frac < 1.0   # some positives dropped, some kept

    # ---- Test 3: multi-K accumulator path (forced small tk) ----
    in2, out2 = 256, 128
    xb = jax.random.normal(kx2, (2, 8, in2), dtype=jnp.float32)
    w2, b2v = init_fc_params(kp2, in2, out2)
    params2 = prepare_fc_params(w2, b2v)
    y2 = fc_forward(xb, params2, use_relu=True, dropout_r=0.0, training=False,
                    tm=8, tn=128, tk=128)
    y2 = jax.block_until_ready(y2)
    ref2 = jnp.maximum(xb @ w2.T + b2v, 0.0)
    assert jnp.allclose(y2, ref2, atol=1e-4, rtol=1e-4)

    print("KERNEL_OK")
</pallas_src>

<mosaic_0001>
module attributes {stable_mosaic.version = 11 : i64} {
  func.func @_fc_kernel_single(%arg0: i32, %arg1: i32, %arg2: memref<1xi32, #tpu.memory_space<smem>>, %arg3: memref<8x128xf32, #tpu.memory_space<vmem>>, %arg4: memref<128x128xf32, #tpu.memory_space<vmem>>, %arg5: memref<1x128xf32, #tpu.memory_space<vmem>>, %arg6: memref<8x128xf32, #tpu.memory_space<vmem>>) attributes {dimension_semantics = [#tpu.dimension_semantics<parallel>, #tpu.dimension_semantics<parallel>], iteration_bounds = array<i64: 2, 1>, scalar_prefetch = 1 : i64, scratch_operands = 0 : i64, tpu.core_type = #tpu.core_type<tc>, window_params = [{transform_indices = @transform_0, window_bounds = array<i64: 8, 128>}, {transform_indices = @transform_1, window_bounds = array<i64: 128, 128>}, {transform_indices = @transform_2, window_bounds = array<i64: 1, 128>}, {transform_indices = @transform_3, window_bounds = array<i64: 8, 128>}]} {
    %c0 = arith.constant 0 : index
    %c0_0 = arith.constant 0 : index
    %0 = vector.load %arg3[%c0, %c0_0] : memref<8x128xf32, #tpu.memory_space<vmem>>, vector<8x128xf32>
    %c0_1 = arith.constant 0 : index
    %c0_2 = arith.constant 0 : index
    %1 = vector.load %arg4[%c0_1, %c0_2] : memref<128x128xf32, #tpu.memory_space<vmem>>, vector<128x128xf32>
    %cst = arith.constant dense<0.000000e+00> : vector<8x128xf32>
    %2 = tpu.matmul %0, %1, %cst {dimension_numbers = #tpu.dot_dimension_numbers<[1], [0], [0], [1], [0, 0, 1, 1], [], []>} : vector<8x128xf32>, vector<128x128xf32>, vector<8x128xf32> -> vector<8x128xf32>
    %c0_3 = arith.constant 0 : index
    %c0_4 = arith.constant 0 : index
    %3 = vector.load %arg5[%c0_3, %c0_4] : memref<1x128xf32, #tpu.memory_space<vmem>>, vector<1x128xf32>
    %4 = vector.broadcast %3 : vector<1x128xf32> to vector<8x128xf32>
    %5 = arith.addf %2, %4 : vector<8x128xf32>
    %cst_5 = arith.constant 0.000000e+00 : f32
    %6 = vector.broadcast %cst_5 : f32 to vector<8x128xf32>
    %7 = arith.maximumf %5, %6 : vector<8x128xf32>
    %c0_6 = arith.constant 0 : index
    %c0_7 = arith.constant 0 : index
    %8 = vector.load %arg6[%c0_6, %c0_7] : memref<8x128xf32, #tpu.memory_space<vmem>>, vector<8x128xf32>
    tpu.vector_store %arg6[%c0_6, %c0_7], %7 {strides = array<i32>} : memref<8x128xf32, #tpu.memory_space<vmem>>, vector<8x128xf32>,
    return
  }
  func.func @transform_0(%arg0: i32, %arg1: i32, %arg2: memref<1xi32, #tpu.memory_space<smem>>) -> (i32, i32) {
    %c0_i32 = arith.constant 0 : i32
    %c0_i32_0 = arith.constant 0 : i32
    return %arg0, %c0_i32 : i32, i32
  }
  func.func @transform_1(%arg0: i32, %arg1: i32, %arg2: memref<1xi32, #tpu.memory_space<smem>>) -> (i32, i32) {
    %c0_i32 = arith.constant 0 : i32
    %c0_i32_0 = arith.constant 0 : i32
    return %c0_i32, %arg1 : i32, i32
  }
  func.func @transform_2(%arg0: i32, %arg1: i32, %arg2: memref<1xi32, #tpu.memory_space<smem>>) -> (i32, i32) {
    %c0_i32 = arith.constant 0 : i32
    %c0_i32_0 = arith.constant 0 : i32
    return %c0_i32, %arg1 : i32, i32
  }
  func.func @transform_3(%arg0: i32, %arg1: i32, %arg2: memref<1xi32, #tpu.memory_space<smem>>) -> (i32, i32) {
    %c0_i32 = arith.constant 0 : i32
    return %arg0, %arg1 : i32, i32
  }
}

</mosaic_0001>

<bundles_post_ra>
// kernel: tpu_custom_call.1
= control target key start
LH: loop header
LB: loop body
LE: loop exit
PB: predicated region body
PF: predicated region fallthrough
CT: control target
= control target key end

     0   :  { %10 = vsyncpa [#allocation5], 0  ;;  %s1026_s0 = inlined_call_operand.<no memory space> [shape: s32[1], index: 0, kind: input, shape index: {}]   ;;  %s1027_s1 = inlined_call_operand.hbm [shape: f32[16,128], index: 1, kind: input, shape index: {}]   ;;  %s1028_s2 = inlined_call_operand.hbm [shape: f32[128,128], index: 2, kind: input, shape index: {}]   ;;  %s1029_s3 = inlined_call_operand.vmem [shape: f32[1,128], index: 3, kind: input, shape index: {}]   ;;  %s1030_s4 = inlined_call_operand.hbm [shape: f32[16,128], index: 4, kind: output, shape index: {}]  }
   0x1   :  { %12 = vsyncpa [#allocation5 + $0x1], 0 }
   0x2   :  { %13 = vsyncpa [#allocation8], 0 }
   0x3   :  { %14 = vsyncpa [#allocation6], 0 }
   0x4   :  { %16 = vsyncpa [#allocation6 + $0x1], 0  ;;  %s802_s15 = smov 0   ;;  %s804_s0 = smov 0  }
   0x5   :  { %s806_s16 = smov 0   ;;  %s808_s17 = smov 0  }
   0x6   :  { %s810_s18 = smov 0   ;;  %s812_s19 = smov 0  }
   0x7 LB: > { %s452_s20 = sadd.s32 4294967295, %s767_s19   ;;  %s453_s21 = sadd.s32 4294967294, %s767_s19   ;;  %s767_s19 = sphi %s812_s19, %s22_s19   ;;  %s763_s18 = sphi %s810_s18, %s1054_s18   ;;  %s759_s17 = sphi %s808_s17, %s1053_s17   ;;  %s755_s16 = sphi %s806_s16, %s1052_s16   ;;  %s751_s0 = sphi %s804_s0, %s1051_s0   ;;  %s747_s15 = sphi %s802_s15, %s1050_s15  }
   0x8   : > { %p54_p0 = scmp.ne.s32.totalorder %s751_s0, %s747_s15  ;;  %p836_p1 = scmp.eq.s32.totalorder %s452_s20, 0 }
   0x9   : > { %p840_p2 = scmp.eq.s32.totalorder %s452_s20, 1  ;;  %p138_p3 = scmp.eq.s32.totalorder %s453_s21, 1 }
   0xa   : > { %s1035_s22 = scalar_select %p836_p1, 1, 0 }
   0xb   : > { %s1036_s23 = scalar_select %p840_p2, 1, 0 }
   0xc   : > { %p846_p4 = por %p836_p1, %p54_p0  ;;  %p454_p5 = scmp.ge.s32.totalorder %s767_s19, 1 }
   0xd   : > { %p851_p6 = por %p138_p3, %p54_p0  ;;  %p145_p7 = scmp.lt.s32.totalorder %s767_s19, 3 }
   0xe   : > { %s1037_s24 = scalar_select %p846_p4, 1, 0 }
   0xf   : > { %s1038_s25 = scalar_select %p851_p6, 1, 0 }
  0x10   : > { %p856_p8 = pnand %p454_p5, %p145_p7  ;;  %s769_s27 = smov [#allocation7]  }
  0x11   : > { %s159_s28 = sshll.u32 %s769_s27, 4  ;;  %s34_s30 = sadd.s32 1, %s763_s18  ;;  %s160_s28 = int_to_ptr.vmem [resolvable:$true] %s159_s28 }
  0x12   : > { %s1039_s26 = scalar_select %p856_p8, 1, 0 }
  0x13   : > { %p553_p9 = pneg %p856_p8  ;;  %s623_s7 = scalar_lea.hbm %s1028_s2, 2048 }
  0x14   : > { %p624_p12 = scmp.ne.s32.totalorder %s1028_s2, %s623_s7  ;;  %p630_p5 = scmp.lt.u32.totalorder %s623_s7, %s1028_s2 }
  0x15   : > { %p865_p11 = pnand %p553_p9, %p836_p1 }
  0x17   : > { %p625_p13 = pneg %p865_p11 }
  0x19   : > { %p626_p0 = pnand %p625_p13, %p624_p12 }
  0x1b   : > { %p627_p3 = pneg %p626_p0 }
  0x1d   : > { %p632_p7 = pnand %p630_p5, %p627_p3 }
  0x1f   : > { %635 = shalt.err (!%p632_p7)
}
  0x20   : > { %s636_s12 = scalar_lea.vmem %s160_s28, 2048  ;;  %p644_p1 = scmp.lt.s32.totalorder %s160_s28, %s160_s28 }
  0x21   : > { %p637_p9 = scmp.ne.s32.totalorder %s160_s28, %s636_s12  ;;  %p645_p4 = scmp.lt.s32.totalorder %s636_s12, %s636_s12 }
  0x23   : > { %p639_p10 = pnand %p637_p9, %p625_p13  ;;  %p646_p8 = por %p645_p4, %p644_p1 }
  0x25   : > { %p640_p6 = pneg %p639_p10 }
  0x27   : > { %p647_p2 = pnand %p646_p8, %p640_p6 }
  0x29   : > { %650 = shalt.err (!%p647_p2)
}
  0x2a   : > { %s770_s13 = smov 128   ;;  %s771_s14 = smov 8  }
  0x2b   : > { %556 = dma.hbm_to_vmem [thread:$0]  (!%p865_p11), %s1028_s2, 2048, %s160_s28, [#allocation8], %s770_s13, %s770_s13, %s771_s14  }
  0x2c   : > { %p36_p1 = scmp.ge.s32.totalorder %s34_s30, 2  ;;  %s41_s27 = sadd.s32 1, %s755_s16 }
  0x2d   : > { %p48_p2 = scmp.ne.s32.totalorder %s755_s16, %s751_s0  ;;  %p49_p4 = scmp.eq.s32.totalorder %s767_s19, 0 }
  0x2e   : > { %s1056_s30 = smov (%p36_p1, %s34_s30), 0  ;;  %p1042_p8 = scmp.ne.s32.totalorder %s1036_s23, 0 }
  0x2f   : > { %p892_p6 = por %p49_p4, %p48_p2  ;;  %s38_s29 = ssub.s32 %s763_s18, %s1056_s30 }
  0x30   : > { %p898_p10 = por %p1042_p8, %p48_p2  ;;  %p566_p12 = scmp.lt.s32.totalorder %s767_s19, 2 }
  0x31   : > { %p39_p11 = scmp.eq.s32.totalorder %s38_s29, 0  ;;  %s179_s28 = sand.u32 1, %s755_s16  }
  0x32   : > { %s458_s7 = sshll.u32 %s179_s28, 3  ;;  %s459_s9 = sshll.u32 %s763_s18, 7 }
  0x33   : > { %s907_s8 = scalar_select %p39_p11, %s755_s16, %s41_s27  }
  0x34   : > { %s913_s12 = scalar_lea.hbm %s1027_s1, %s459_s9  ;;  %s183_s23 = scalar_lea.vmem [#allocation4], %s458_s7 }
  0x35   : > { %s190_s13 = sshll.u32 %s183_s23, 4  ;;  %p919_p13 = pnand %p566_p12, %p892_p6  ;;  %s915_s13 = int_to_ptr.vmem [resolvable:$true] %s190_s13 }
  0x36   : > { %s180_s20 = scalar_lea.sflag [#allocation5], %s179_s28  ;;  %s651_s21 = scalar_lea.hbm %s913_s12, 128 }
  0x37   : > { %p652_p0 = scmp.ne.s32.totalorder %s913_s12, %s651_s21  ;;  %p653_p3 = pneg %p919_p13 }
  0x38   : > { %s656_s7 = scalar_lea.hbm %s1027_s1, 256  ;;  %p657_p9 = scmp.lt.u32.totalorder %s913_s12, %s1027_s1 }
  0x39   : > { %p654_p5 = pnand %p653_p3, %p652_p0  ;;  %p658_p1 = scmp.lt.u32.totalorder %s656_s7, %s651_s21 }
  0x3a   : > { %p660_p4 = scmp.lt.u32.totalorder %s651_s21, %s913_s12 }
  0x3b   : > { %p655_p7 = pneg %p654_p5  ;;  %p659_p2 = por %p658_p1, %p657_p9 }
  0x3d   : > { %p661_p6 = por %p660_p4, %p659_p2 }
  0x3f   : > { %p662_p8 = pnand %p661_p6, %p655_p7 }
  0x41   : > { %665 = shalt.err (!%p662_p8)
}
  0x42   : > { %s666_s28 = scalar_lea.vmem %s915_s13, 128  ;;  %s772_s10 = smov [#allocation4]  }
  0x43   : > { %p667_p12 = scmp.ne.s32.totalorder %s915_s13, %s666_s28  ;;  %s671_s11 = sshll.u32 %s772_s10, 4  ;;  %s672_s11 = int_to_ptr.vmem [resolvable:$false] %s671_s11 }
  0x44   : > { %s673_s23 = scalar_lea.vmem %s672_s11, 256  ;;  %p674_p5 = scmp.lt.s32.totalorder %s915_s13, %s672_s11 }
  0x45   : > { %p669_p11 = pnand %p667_p12, %p653_p3  ;;  %p675_p9 = scmp.lt.s32.totalorder %s673_s23, %s666_s28 }
  0x47   : > { %p670_p0 = pneg %p669_p11  ;;  %p676_p1 = por %p675_p9, %p674_p5 }
  0x49   : > { %p677_p2 = pnand %p676_p1, %p670_p0 }
  0x4b   : > { %680 = shalt.err (!%p677_p2)
}
  0x4c   : > { %560 = dma.hbm_to_vmem [thread:$0]  (!%p919_p13), %s913_s12, 128, %s915_s13, %s180_s20  }
  0x4d   : > { %p1045_p7 = scmp.ne.s32.totalorder %s1039_s26, 0 }
  0x4e   : > { %s951_s21 = sand.u32 (!%p1045_p7), 1, %s751_s0   ;;  %p1046_p3 = scmp.ne.s32.totalorder (!%p1045_p7), %s1037_s24, 0 }
  0x4f   : > { %199 = sbr.rel (%p1045_p7) target bundleno = 355 (0x163), region = 32  ;;  %s461_s27 = sshll.u32 (!%p1045_p7), %s951_s21, 3 }
  0x50   : > { %s202_s29 = scalar_lea.sflag (!%p1045_p7), [#allocation5], %s951_s21  ;;  %s957_s7 = scalar_lea.vmem (!%p1045_p7), [#allocation4], %s461_s27 }
  0x56   : > { %734 = dma.done.wait (%p1046_p3), %s202_s29, 128  }
  0x57   : > { %736 = vsyncadd (%p1046_p3), %s202_s29, 4294967168  ;;  %p1047_p13 = scmp.ne.s32.totalorder %s1035_s22, 0 }
  0x59   : > { %738 = dma.done.wait (%p1047_p13), [#allocation8], 2048  }
  0x5a   : > { %740 = vsyncadd (%p1047_p13), [#allocation8], 4294965248  ;;  %v773_v0 = vmov 0.0|0.0   ;;  %vm774_vm0 = vmmov 0   ;;  %v775_v1 = vmov 0.0   ;;  %v239_v2 = vld [vmem:[#allocation7] sm:$0xff] }
  0x5b   : > { %521 = vmatprep.subr.bf16.mxu0 %v773_v0  ;;  %518 = vmatprep.mubr.msk.f32.mxu0 %vm774_vm0, %v775_v1  ;;  %v240_v3 = vld [vmem:[#allocation7 + $0x8] sm:$0xff]  ;;  %v241_v4 = vld [vmem:[#allocation7 + $0x10] sm:$0xff]  ;;  %v242_v6 = vld [vmem:[#allocation7 + $0x18] sm:$0xff]  ;;  %s466_s26 = sshll.u32 %s759_s17, 7  ;;  %s234_s12 = scalar_lea.vmem [#allocation9], %s461_s27 }
  0x5c   : > { %v522_v5 = vpack.c.bf16 %v240_v3, %v239_v2  ;;  %v525_v7 = vpack.c.bf16 %v242_v6, %v241_v4  ;;  %v243_v8 = vld [vmem:[#allocation7 + $0x20] sm:$0xff]  ;;  %v244_v9 = vld [vmem:[#allocation7 + $0x28] sm:$0xff]  ;;  %v245_v11 = vld [vmem:[#allocation7 + $0x30] sm:$0xff]  ;;  %s349_s13 = sshll.u32 %s234_s12, 4  ;;  %s977_s5 = scalar_lea.hbm %s1030_s4, %s466_s26  ;;  %s979_s13 = int_to_ptr.vmem [resolvable:$true] %s349_s13 }
  0x5d   : > { %v528_v10 = vpack.c.bf16 %v244_v9, %v243_v8  ;;  %v246_v12 = vld [vmem:[#allocation7 + $0x38] sm:$0xff]  ;;  %v247_v14 = vld [vmem:[#allocation7 + $0x40] sm:$0xff]  ;;  %v248_v15 = vld [vmem:[#allocation7 + $0x48] sm:$0xff]  ;;  %s335_s9 = scalar_lea.sflag [#allocation6], %s951_s21  ;;  %s681_s28 = scalar_lea.vmem %s979_s13, 128 }
  0x5e   : > { %523 = vmatpush3.bf16.msra.mxu0 %v522_v5  ;;  %v531_v13 = vpack.c.bf16 %v246_v12, %v245_v11  ;;  %v534_v16 = vpack.c.bf16 %v248_v15, %v247_v14  ;;  %v249_v17 = vld [vmem:[#allocation7 + $0x50] sm:$0xff]  ;;  %v250_v18 = vld [vmem:[#allocation7 + $0x58] sm:$0xff]  ;;  %v251_v20 = vld [vmem:[#allocation7 + $0x60] sm:$0xff]  ;;  %p682_p4 = scmp.ne.s32.totalorder %s979_s13, %s681_s28  ;;  %s776_s17 = smov [#allocation9]  }
  0x5f   : > { %524 = vmatprep.subr.bf16.mxu0 %v773_v0  ;;  %v537_v19 = vpack.c.bf16 %v250_v18, %v249_v17  ;;  %v252_v21 = vld [vmem:[#allocation7 + $0x68] sm:$0xff]  ;;  %v253_v23 = vld [vmem:[#allocation7 + $0x70] sm:$0xff]  ;;  %v254_v24 = vld [vmem:[#allocation7 + $0x78] sm:$0xff]  ;;  %s685_s10 = sshll.u32 %s776_s17, 4  ;;  %s686_s10 = int_to_ptr.vmem [resolvable:$false] %s685_s10 }
  0x60   : > { %v540_v22 = vpack.c.bf16 %v252_v21, %v251_v20  ;;  %v543_v25 = vpack.c.bf16 %v254_v24, %v253_v23  ;;  %v238_v26 = vld [vmem:[%s957_s7] sm:$0xff]  ;;  %p683_p6 = pnand %p682_p4, %p898_p10  ;;  %s687_s11 = scalar_lea.vmem %s686_s10, 256 }
  0x61   : > { %v464_v27 = vld [vmem:[%s1029_s3] ss:$0 sm:$0xff]  ;;  %p688_p12 = scmp.lt.s32.totalorder %s979_s13, %s686_s10  ;;  %p689_p11 = scmp.lt.s32.totalorder %s687_s11, %s681_s28 }
  0x62   : > { %526 = vmatpush3.bf16.msra.mxu0 %v525_v7  ;;  %p684_p8 = pneg %p683_p6 }
  0x63   : > { %527 = vmatprep.subr.bf16.mxu0 %v773_v0  ;;  %p690_p0 = por %p689_p11, %p688_p12 }
  0x65   : > { %p691_p5 = pnand %p690_p0, %p684_p8 }
  0x66   : > { %529 = vmatpush3.bf16.msra.mxu0 %v528_v10 }
  0x67   : > { %530 = vmatprep.subr.bf16.mxu0 %v773_v0 }
  0x6a   : > { %532 = vmatpush3.bf16.msra.mxu0 %v531_v13 }
  0x6b   : > { %533 = vmatprep.subr.bf16.mxu0 %v773_v0 }
  0x6e   : > { %535 = vmatpush3.bf16.msra.mxu0 %v534_v16 }
  0x6f   : > { %536 = vmatprep.subr.bf16.mxu0 %v773_v0 }
  0x72   : > { %538 = vmatpush3.bf16.msra.mxu0 %v537_v19 }
  0x73   : > { %539 = vmatprep.subr.bf16.mxu0 %v773_v0 }
  0x76   : > { %541 = vmatpush3.bf16.msra.mxu0 %v540_v22 }
  0x77   : > { %542 = vmatprep.subr.bf16.mxu0 %v773_v0 }
  0x7a   : > { %544 = vmatpush3.bf16.msra.mxu0 %v543_v25 }
  0x7d   : > { %519 = vmatmul.mubr.f32.vlgmr.msra.gmra.mrb[0].mxu0 %v238_v26 }
 0x150   : > { %v328_v28 = vpop.f32.mrb[0].mxu0 }
 0x151   : > { %v329_v29 = vadd.f32 %v464_v27, %v328_v28  ;;  %v520_v30 = vpop.f32.mrb[1].mxu0 }
 0x153   : > { %v332_v31 = vmax.f32 %v329_v29, 0.0 }
 0x155   : > { %333 = vst [vmem:[%s234_s12] sm:$0xff] %v332_v31 }
 0x156   : > { %694 = shalt.err (!%p691_p5)
}
 0x157   : > { %s695_s23 = scalar_lea.hbm %s977_s5, 128  ;;  %s699_s29 = scalar_lea.hbm %s1030_s4, 256 }
 0x158   : > { %p696_p9 = scmp.ne.s32.totalorder %s977_s5, %s695_s23  ;;  %p700_p7 = scmp.lt.u32.totalorder %s977_s5, %s1030_s4 }
 0x159   : > { %p701_p3 = scmp.lt.u32.totalorder %s699_s29, %s695_s23  ;;  %p703_p4 = scmp.lt.u32.totalorder %s695_s23, %s977_s5 }
 0x15a   : > { %p697_p1 = pnand %p696_p9, %p898_p10 }
 0x15b   : > { %p702_p13 = por %p701_p3, %p700_p7 }
 0x15c   : > { %p698_p2 = pneg %p697_p1 }
 0x15d   : > { %p704_p6 = por %p703_p4, %p702_p13 }
 0x15f   : > { %p705_p8 = pnand %p704_p6, %p698_p2 }
 0x161   : > { %708 = shalt.err (!%p705_p8)
}
 0x162   : > { %551 = dma.vmem_to_hbm [thread:$0]  (%p898_p10), %s979_s13, 128, %s977_s5, %s335_s9  }
 0x163 PF: > { %s361_s24 = sand.u32 1, %s747_s15   ;;  %p1048_p12 = scmp.ne.s32.totalorder %s1038_s25, 0 }
 0x164   : > { %p1049_p11 = scmp.ge.s32.totalorder %s767_s19, 2  ;;  %s362_s26 = scalar_lea.sflag [#allocation6], %s361_s24 }
 0x166   : > { %p562_p0 = pnand %p1049_p11, %p1048_p12 }
 0x168   : > { %742 = dma.done.wait (!%p562_p0), %s362_s26, 128  }
 0x169   : > { %744 = vsyncadd (!%p562_p0), %s362_s26, 4294967168  ;;  %s22_s19 = sadd.s32 1, %s767_s19   ;;  %s1050_s15 = smov %s751_s0 }
 0x16a   : > { %p19_p5 = scmp.ge.s32.totalorder %s22_s19, 4   ;;  %s1051_s0 = smov %s755_s16 }
 0x16b   : > { %s1052_s16 = smov %s907_s8  ;;  %s1053_s17 = smov %s763_s18 }
 0x16c   : > { %s1054_s18 = smov %s1056_s30  ;;  %21 = sbr.rel (!%p19_p5) target bundleno = 7 (0x7), region = 85 }
 0x173   :  { %367 = vsyncpa [#allocation5], 1 }
 0x174   :  { %369 = vsyncpa [#allocation5 + $0x1], 1 }
 0x175   :  { %370 = vsyncpa [#allocation8], 1 }
 0x176   :  { %371 = vsyncpa [#allocation6], 1 }
 0x177   :  { %373 = vsyncpa [#allocation6 + $0x1], 1 }

</bundles_post_ra>
